<compile_context>
chip_gen: v6e
topology: v6e:2x2x1
jax: 0.10.0
libtpu: 0.0.40
codegen_flags: <defaults>
</compile_context>

<pallas_src>
import functools
import math

import jax
import jax.numpy as jnp
from jax import lax
from jax.experimental import pallas as pl
from jax.experimental.pallas import tpu as pltpu

_VMEM = pltpu.MemorySpace.VMEM

# Set to jnp.bfloat16 on v6e/v7x for the large projection matmuls (f32
# accumulation is kept); jnp.float32 preserves exact parity with the PyTorch
# float32 reference, so that is the default here.
_MATMUL_DTYPE = jnp.float32


def _mm(a, b):
    """MXU matmul with optional bf16 operand cast, f32 accumulation."""
    return jnp.dot(a.astype(_MATMUL_DTYPE), b.astype(_MATMUL_DTYPE),
                   preferred_element_type=jnp.float32)


def _row_block(n, target=512):
    """Row tile for batched linear kernels: full if small, else 512 (mult of 8)."""
    return n if n <= target else target


# --------------------------------------------------------------------------
# Kernel 1: fused BiLSTM.fc1 (+tanh) and layer-0 input-gate projection.
#   gx0 = tanh(enc @ W1^T + b1) @ [W_ih_f^T | W_ih_b^T] + [b_f | b_b]
# --------------------------------------------------------------------------
def _fc1_gate_proj_kernel(enc_ref, w1t_ref, b1_ref, wiht_ref, bg_ref, gx_ref):
    x = jnp.tanh(_mm(enc_ref[...], w1t_ref[...]) + b1_ref[...])
    gx_ref[...] = (_mm(x, wiht_ref[...]) + bg_ref[...]).astype(gx_ref.dtype)


def fc1_gate_proj(enc, w1_t, b1, wih_cat_t, bgate):
    n, fin = enc.shape
    h = w1_t.shape[1]
    g = wih_cat_t.shape[1]
    bm = _row_block(n)
    return pl.pallas_call(
        _fc1_gate_proj_kernel,
        out_shape=jax.ShapeDtypeStruct((n, g), enc.dtype),
        grid=(pl.cdiv(n, bm),),
        in_specs=[
            pl.BlockSpec((bm, fin), lambda i: (i, 0)),
            pl.BlockSpec((fin, h), lambda i: (0, 0)),
            pl.BlockSpec((1, h), lambda i: (0, 0)),
            pl.BlockSpec((h, g), lambda i: (0, 0)),
            pl.BlockSpec((1, g), lambda i: (0, 0)),
        ],
        out_specs=pl.BlockSpec((bm, g), lambda i: (i, 0)),
        compiler_params=pltpu.CompilerParams(dimension_semantics=("parallel",)),
    )(enc, w1_t, b1, wih_cat_t, bgate)


# --------------------------------------------------------------------------
# Kernel 2: hoisted input-gate projection for layers >= 1 (plain linear).
# --------------------------------------------------------------------------
def _gate_proj_kernel(x_ref, wt_ref, b_ref, o_ref):
    o_ref[...] = (_mm(x_ref[...], wt_ref[...]) + b_ref[...]).astype(o_ref.dtype)


def gate_proj(x, wih_cat_t, bgate):
    n, fin = x.shape
    g = wih_cat_t.shape[1]
    bm = _row_block(n)
    return pl.pallas_call(
        _gate_proj_kernel,
        out_shape=jax.ShapeDtypeStruct((n, g), x.dtype),
        grid=(pl.cdiv(n, bm),),
        in_specs=[
            pl.BlockSpec((bm, fin), lambda i: (i, 0)),
            pl.BlockSpec((fin, g), lambda i: (0, 0)),
            pl.BlockSpec((1, g), lambda i: (0, 0)),
        ],
        out_specs=pl.BlockSpec((bm, g), lambda i: (i, 0)),
        compiler_params=pltpu.CompilerParams(dimension_semantics=("parallel",)),
    )(x, wih_cat_t, bgate)


# --------------------------------------------------------------------------
# Kernel 3: one bidirectional LSTM layer, both directions fused, whole
# sequence in VMEM, time recurrence via an in-kernel fori_loop.
#
# gx_ref  : (T, B, 8H)  precomputed x-gates  [fwd i f g o | bwd i f g o]
#           (already includes b_ih + b_hh for both directions)
# whh_ref : (2H, 8H)    block-diagonal recurrent weights:
#           [:H, :4H] = W_hh_f^T, [H:, 4H:] = W_hh_b^T, zeros elsewhere.
# y_ref   : (T, B, 2H)  output  [h_fwd | h_bwd]  per timestep
# --------------------------------------------------------------------------
def _bilstm_layer_kernel(gx_ref, whh_ref, y_ref, *, hidden, seq_len, batch):
    H, T, B = hidden, seq_len, batch
    whh = whh_ref[...]                                        # (2H, 8H), loop-invariant

    # Loop-invariant g-lane mask (lanes [2H, 3H) within each direction's 4H block).
    lane = lax.broadcasted_iota(jnp.int32, (B, 4 * H), 1)
    is_g = (lane >= 2 * H) & (lane < 3 * H)

    def nonlin(g):
        # tanh on the g block, sigmoid elsewhere, with a single EUP transcendental
        # per lane via sigmoid(x) = 0.5 * (1 + tanh(x / 2)).
        pre = jnp.where(is_g, g, 0.5 * g)
        th = jnp.tanh(pre)
        return jnp.where(is_g, th, 0.5 * th + 0.5)

    def step(t, carry):
        h_f, h_b, c_f, c_b = carry                            # each (B, H), vreg-resident
        rt = T - 1 - t

        hcat = jnp.concatenate([h_f, h_b], axis=1)            # (B, 2H)
        recur = jnp.dot(hcat, whh, preferred_element_type=jnp.float32)   # (B, 8H)

        gates_f = gx_ref[t][:, :4 * H] + recur[:, :4 * H]     # (B, 4H)
        gates_b = gx_ref[rt][:, 4 * H:] + recur[:, 4 * H:]    # (B, 4H)

        a_f = nonlin(gates_f)
        a_b = nonlin(gates_b)

        # PyTorch gate order: i, f, g, o.
        c_f_new = a_f[:, H:2 * H] * c_f + a_f[:, 0:H] * a_f[:, 2 * H:3 * H]
        c_b_new = a_b[:, H:2 * H] * c_b + a_b[:, 0:H] * a_b[:, 2 * H:3 * H]
        h_f_new = a_f[:, 3 * H:4 * H] * jnp.tanh(c_f_new)
        h_b_new = a_b[:, 3 * H:4 * H] * jnp.tanh(c_b_new)

        # Store straight into the layer output: forward hidden at time t,
        # backward hidden belongs to time T-1-t.
        y_ref[t, :, pl.ds(0, H)] = h_f_new.astype(y_ref.dtype)
        y_ref[rt, :, pl.ds(H, H)] = h_b_new.astype(y_ref.dtype)
        return (h_f_new, h_b_new, c_f_new, c_b_new)

    zeros = jnp.zeros((B, H), jnp.float32)
    lax.fori_loop(0, T, step, (zeros, zeros, zeros, zeros), unroll=4)


def bilstm_layer(gx, whh_blk, *, hidden):
    T, B, _ = gx.shape
    H = hidden
    kernel = functools.partial(_bilstm_layer_kernel, hidden=H, seq_len=T, batch=B)
    # Explicit VMEM budget: gx + y + whh (no scratch buffers anymore), with headroom.
    resident = 4 * (T * B * 10 * H + 16 * H * H)
    vmem_limit = min(2 * resident + (4 << 20), 128 << 20)
    return pl.pallas_call(
        kernel,
        out_shape=jax.ShapeDtypeStruct((T, B, 2 * H), gx.dtype),
        in_specs=[pl.BlockSpec(memory_space=_VMEM)] * 2,
        out_specs=pl.BlockSpec(memory_space=_VMEM),
        compiler_params=pltpu.CompilerParams(vmem_limit_bytes=vmem_limit),
    )(gx, whh_blk)


# --------------------------------------------------------------------------
# Kernel 4: fused tail: tanh(LSTM out) -> [dropout id] -> tanh(fc2) -> tanh(pos fc1)
# --------------------------------------------------------------------------
def _tail_kernel(y_ref, w2t_ref, b2_ref, w3t_ref, b3_ref, o_ref):
    z = jnp.tanh(y_ref[...])
    # TODO(synk): training-mode dropout not implemented (identity == eval / p=0).
    z = jnp.tanh(_mm(z, w2t_ref[...]) + b2_ref[...])
    o_ref[...] = jnp.tanh(_mm(z, w3t_ref[...]) + b3_ref[...]).astype(o_ref.dtype)


def tail_head(y, w2_t, b2, w3_t, b3):
    n, f2 = y.shape
    h = w2_t.shape[1]
    out = w3_t.shape[1]
    bm = _row_block(n)
    return pl.pallas_call(
        _tail_kernel,
        out_shape=jax.ShapeDtypeStruct((n, out), y.dtype),
        grid=(pl.cdiv(n, bm),),
        in_specs=[
            pl.BlockSpec((bm, f2), lambda i: (i, 0)),
            pl.BlockSpec((f2, h), lambda i: (0, 0)),
            pl.BlockSpec((1, h), lambda i: (0, 0)),
            pl.BlockSpec((h, out), lambda i: (0, 0)),
            pl.BlockSpec((1, out), lambda i: (0, 0)),
        ],
        out_specs=pl.BlockSpec((bm, out), lambda i: (i, 0)),
        compiler_params=pltpu.CompilerParams(dimension_semantics=("parallel",)),
    )(y, w2_t, b2, w3_t, b3)


# --------------------------------------------------------------------------
# Parameter construction (deterministic, mirrors the PyTorch __init__ shapes)
# --------------------------------------------------------------------------
def _xavier_normal(key, shape):
    fan_out, fan_in = shape
    std = math.sqrt(2.0 / (fan_in + fan_out))
    return std * jax.random.normal(key, shape, dtype=jnp.float32)


def init_params(key, input_size, output_size, hidden_size, num_layers):
    H = hidden_size
    keys = iter(jax.random.split(key, 64))
    p = {"hidden_size": H, "num_layers": num_layers}

    # BiLSTM.fc1: Linear(input_size -> H), xavier_normal weight, bias = 0.1
    p["blstm_fc1_w"] = _xavier_normal(next(keys), (H, input_size))
    p["blstm_fc1_b"] = jnp.full((H,), 0.1, jnp.float32)

    # nn.LSTM(H, H, bidirectional=True, num_layers): default uniform(-k, k)
    k = 1.0 / math.sqrt(H)
    lstm = []
    for layer in range(num_layers):
        fin = H if layer == 0 else 2 * H
        layer_p = {}
        for direction in ("fwd", "bwd"):
            layer_p[direction] = {
                "w_ih": jax.random.uniform(next(keys), (4 * H, fin), jnp.float32, -k, k),
                "w_hh": jax.random.uniform(next(keys), (4 * H, H), jnp.float32, -k, k),
                "b_ih": jax.random.uniform(next(keys), (4 * H,), jnp.float32, -k, k),
                "b_hh": jax.random.uniform(next(keys), (4 * H,), jnp.float32, -k, k),
            }
        lstm.append(layer_p)
    p["lstm"] = lstm

    # BiLSTM.fc2: Linear(2H -> hidden_size)  (BiLSTM's output_size == RNN_pos hidden)
    p["blstm_fc2_w"] = _xavier_normal(next(keys), (H, 2 * H))
    p["blstm_fc2_b"] = jnp.full((H,), 0.1, jnp.float32)

    # RNN_pos.fc1: Linear(hidden_size -> output_size)  (tanh applied, per reference)
    p["pos_fc1_w"] = _xavier_normal(next(keys), (output_size, H))
    p["pos_fc1_b"] = jnp.full((output_size,), 0.1, jnp.float32)
    return p


def prepare_params(params):
    """One-time kernel-layout weight prep (transposes / concats / block-diag)."""
    H = params["hidden_size"]
    L = params["num_layers"]
    prep = {"H": H, "L": L}
    prep["fc1_w_t"] = jnp.transpose(params["blstm_fc1_w"])            # (in, H)
    prep["fc1_b"] = params["blstm_fc1_b"].reshape(1, H)

    layers = []
    for layer in range(L):
        wf = params["lstm"][layer]["fwd"]
        wb = params["lstm"][layer]["bwd"]
        wih_cat_t = jnp.concatenate(
            [jnp.transpose(wf["w_ih"]), jnp.transpose(wb["w_ih"])], axis=1)   # (fin, 8H)
        bg = jnp.concatenate(
            [wf["b_ih"] + wf["b_hh"], wb["b_ih"] + wb["b_hh"]]).reshape(1, 8 * H)
        whh_blk = jnp.zeros((2 * H, 8 * H), jnp.float32)
        whh_blk = whh_blk.at[:H, :4 * H].set(jnp.transpose(wf["w_hh"]))
        whh_blk = whh_blk.at[H:, 4 * H:].set(jnp.transpose(wb["w_hh"]))
        layers.append({"wih_t": wih_cat_t, "bg": bg, "whh_blk": whh_blk})
    prep["layers"] = layers

    prep["fc2_w_t"] = jnp.transpose(params["blstm_fc2_w"])             # (2H, H)
    prep["fc2_b"] = params["blstm_fc2_b"].reshape(1, H)
    prep["pos_w_t"] = jnp.transpose(params["pos_fc1_w"])               # (H, out)
    prep["pos_b"] = params["pos_fc1_b"].reshape(1, -1)
    return prep


# --------------------------------------------------------------------------
# Forward pass (RNN_pos.forward)
# --------------------------------------------------------------------------
def rnn_pos_forward(prep, ori, acc):
    # ori: (B, T, node, Dori), acc: (B, T, node, Dacc)  -> sequence-first
    acc_t = jnp.transpose(acc, (1, 0, 2, 3))
    ori_t = jnp.transpose(ori, (1, 0, 2, 3))
    T, B = acc_t.shape[0], acc_t.shape[1]
    enc = jnp.concatenate(
        [ori_t.reshape(T, B, -1), acc_t.reshape(T, B, -1)], axis=2)   # (T, B, in)

    H = prep["H"]
    L = prep["L"]

    # Layer 0: BiLSTM.fc1 + tanh fused with the hoisted x @ W_ih projection.
    l0 = prep["layers"][0]
    gx = fc1_gate_proj(enc.reshape(T * B, -1),
                       prep["fc1_w_t"], prep["fc1_b"],
                       l0["wih_t"], l0["bg"]).reshape(T, B, 8 * H)
    y = bilstm_layer(gx, l0["whh_blk"], hidden=H)                     # (T, B, 2H)

    # Remaining layers: one projection kernel + one fused BiLSTM-layer kernel each.
    for layer in range(1, L):
        lw = prep["layers"][layer]
        gx = gate_proj(y.reshape(T * B, 2 * H), lw["wih_t"], lw["bg"]).reshape(T, B, 8 * H)
        y = bilstm_layer(gx, lw["whh_blk"], hidden=H)

    # tanh -> dropout(identity) -> fc2 + tanh -> RNN_pos.fc1 + tanh (fused)
    out = tail_head(y.reshape(T * B, 2 * H),
                    prep["fc2_w_t"], prep["fc2_b"],
                    prep["pos_w_t"], prep["pos_b"])                   # (T*B, out)
    out = out.reshape(T, B, -1)
    return jnp.transpose(out, (1, 0, 2))                              # (B, T, out)


# --------------------------------------------------------------------------
if __name__ == "__main__":
    B, T, NODE = 2, 8, 4
    D_ORI, D_ACC = 9, 3                     # flattened: 4*9 + 4*3 = 48 features
    INPUT_SIZE = NODE * D_ORI + NODE * D_ACC
    HIDDEN = 32
    OUTPUT_SIZE = 12                        # e.g. node * 3 positions
    NUM_LAYERS = 2

    root = jax.random.PRNGKey(0)
    k_ori, k_acc, k_par = jax.random.split(root, 3)
    ori = jax.random.normal(k_ori, (B, T, NODE, D_ORI), dtype=jnp.float32)
    acc = jax.random.normal(k_acc, (B, T, NODE, D_ACC), dtype=jnp.float32)

    params = init_params(k_par, INPUT_SIZE, OUTPUT_SIZE, HIDDEN, NUM_LAYERS)
    prep = prepare_params(params)           # one-time weight layout prep

    out = rnn_pos_forward(prep, ori, acc)
    out = jax.block_until_ready(out)

    assert out.shape == (B, T, OUTPUT_SIZE), out.shape
    assert bool(jnp.all(jnp.isfinite(out)))
    print("KERNEL_OK")
</pallas_src>

<mosaic_0001>
module attributes {stable_mosaic.version = 11 : i64} {
  func.func @_fc1_gate_proj_kernel(%arg0: i32, %arg1: memref<16x48xf32, #tpu.memory_space<vmem>>, %arg2: memref<48x32xf32, #tpu.memory_space<vmem>>, %arg3: memref<1x32xf32, #tpu.memory_space<vmem>>, %arg4: memref<32x256xf32, #tpu.memory_space<vmem>>, %arg5: memref<1x256xf32, #tpu.memory_space<vmem>>, %arg6: memref<16x256xf32, #tpu.memory_space<vmem>>) attributes {dimension_semantics = [#tpu.dimension_semantics<parallel>], iteration_bounds = array<i64: 1>, scalar_prefetch = 0 : i64, scratch_operands = 0 : i64, tpu.core_type = #tpu.core_type<tc>, window_params = [{transform_indices = @transform_0, window_bounds = array<i64: 16, 48>}, {pipeline_mode = #tpu.pipeline_mode<synchronous>, transform_indices = @transform_1, window_bounds = array<i64: 48, 32>}, {pipeline_mode = #tpu.pipeline_mode<synchronous>, transform_indices = @transform_2, window_bounds = array<i64: 1, 32>}, {pipeline_mode = #tpu.pipeline_mode<synchronous>, transform_indices = @transform_3, window_bounds = array<i64: 32, 256>}, {pipeline_mode = #tpu.pipeline_mode<synchronous>, transform_indices = @transform_4, window_bounds = array<i64: 1, 256>}, {transform_indices = @transform_5, window_bounds = array<i64: 16, 256>}]} {
    %c0 = arith.constant 0 : index
    %c0_0 = arith.constant 0 : index
    %0 = vector.load %arg1[%c0, %c0_0] : memref<16x48xf32, #tpu.memory_space<vmem>>, vector<16x48xf32>
    %c0_1 = arith.constant 0 : index
    %c0_2 = arith.constant 0 : index
    %1 = vector.load %arg2[%c0_1, %c0_2] : memref<48x32xf32, #tpu.memory_space<vmem>>, vector<48x32xf32>
    %cst = arith.constant dense<0.000000e+00> : vector<16x32xf32>
    %2 = tpu.matmul %0, %1, %cst {dimension_numbers = #tpu.dot_dimension_numbers<[1], [0], [0], [1], [0, 0, 1, 1], [], []>} : vector<16x48xf32>, vector<48x32xf32>, vector<16x32xf32> -> vector<16x32xf32>
    %c0_3 = arith.constant 0 : index
    %c0_4 = arith.constant 0 : index
    %3 = vector.load %arg3[%c0_3, %c0_4] : memref<1x32xf32, #tpu.memory_space<vmem>>, vector<1x32xf32>
    %4 = vector.broadcast %3 : vector<1x32xf32> to vector<16x32xf32>
    %5 = arith.addf %2, %4 : vector<16x32xf32>
    %6 = math.tanh %5 : vector<16x32xf32>
    %c0_5 = arith.constant 0 : index
    %c0_6 = arith.constant 0 : index
    %7 = vector.load %arg4[%c0_5, %c0_6] : memref<32x256xf32, #tpu.memory_space<vmem>>, vector<32x256xf32>
    %cst_7 = arith.constant dense<0.000000e+00> : vector<16x256xf32>
    %8 = tpu.matmul %6, %7, %cst_7 {dimension_numbers = #tpu.dot_dimension_numbers<[1], [0], [0], [1], [0, 0, 1, 1], [], []>} : vector<16x32xf32>, vector<32x256xf32>, vector<16x256xf32> -> vector<16x256xf32>
    %c0_8 = arith.constant 0 : index
    %c0_9 = arith.constant 0 : index
    %9 = vector.load %arg5[%c0_8, %c0_9] : memref<1x256xf32, #tpu.memory_space<vmem>>, vector<1x256xf32>
    %10 = vector.broadcast %9 : vector<1x256xf32> to vector<16x256xf32>
    %11 = arith.addf %8, %10 : vector<16x256xf32>
    %c0_10 = arith.constant 0 : index
    %c0_11 = arith.constant 0 : index
    %12 = vector.load %arg6[%c0_10, %c0_11] : memref<16x256xf32, #tpu.memory_space<vmem>>, vector<16x256xf32>
    tpu.vector_store %arg6[%c0_10, %c0_11], %11 {strides = array<i32>} : memref<16x256xf32, #tpu.memory_space<vmem>>, vector<16x256xf32>,
    return
  }
  func.func @transform_0(%arg0: i32) -> (i32, i32) {
    %c0_i32 = arith.constant 0 : i32
    %c0_i32_0 = arith.constant 0 : i32
    return %arg0, %c0_i32 : i32, i32
  }
  func.func @transform_1(%arg0: i32) -> (i32, i32) {
    %c0_i32 = arith.constant 0 : i32
    %c0_i32_0 = arith.constant 0 : i32
    %c0_i32_1 = arith.constant 0 : i32
    return %c0_i32, %c0_i32_0 : i32, i32
  }
  func.func @transform_2(%arg0: i32) -> (i32, i32) {
    %c0_i32 = arith.constant 0 : i32
    %c0_i32_0 = arith.constant 0 : i32
    %c0_i32_1 = arith.constant 0 : i32
    return %c0_i32, %c0_i32_0 : i32, i32
  }
  func.func @transform_3(%arg0: i32) -> (i32, i32) {
    %c0_i32 = arith.constant 0 : i32
    %c0_i32_0 = arith.constant 0 : i32
    %c0_i32_1 = arith.constant 0 : i32
    return %c0_i32, %c0_i32_0 : i32, i32
  }
  func.func @transform_4(%arg0: i32) -> (i32, i32) {
    %c0_i32 = arith.constant 0 : i32
    %c0_i32_0 = arith.constant 0 : i32
    %c0_i32_1 = arith.constant 0 : i32
    return %c0_i32, %c0_i32_0 : i32, i32
  }
  func.func @transform_5(%arg0: i32) -> (i32, i32) {
    %c0_i32 = arith.constant 0 : i32
    %c0_i32_0 = arith.constant 0 : i32
    return %arg0, %c0_i32 : i32, i32
  }
}

</mosaic_0001>

<bundles_post_ra>
// kernel: tpu_custom_call.1
= control target key start
LH: loop header
LB: loop body
LE: loop exit
PB: predicated region body
PF: predicated region fallthrough
CT: control target
= control target key end

     0   :  { %vm36_vm0 = vcmask 392192   ;;  %s395_s0 = inlined_call_operand.vmem [shape: f32[16,48], index: 0, kind: input, shape index: {}]   ;;  %s396_s1 = inlined_call_operand.vmem [shape: f32[48,32], index: 1, kind: input, shape index: {}]   ;;  %s397_s2 = inlined_call_operand.vmem [shape: f32[1,32], index: 2, kind: input, shape index: {}]   ;;  %s398_s3 = inlined_call_operand.vmem [shape: f32[32,256], index: 3, kind: input, shape index: {}]   ;;  %s399_s4 = inlined_call_operand.vmem [shape: f32[1,256], index: 4, kind: input, shape index: {}]   ;;  %s400_s5 = inlined_call_operand.hbm [shape: f32[16,256], index: 5, kind: output, shape index: {}]  }
   0x1   :  { %v28_v0 = vld [vmem:[%s396_s1 + $0x28] sm:$0xff]  ;;  %v27_v1 = vld [vmem:[%s396_s1 + $0x20] sm:$0xff]  ;;  %v26_v2 = vld [vmem:[%s396_s1 + $0x18] sm:$0xff] }
   0x2   :  { %257 = vmatprep.subr.mxu0 %v28_v0  ;;  %v21_v3 = vld [vmem:[%s395_s0] sm:$0xff] }
   0x3   :  { %258 = vmatpush3.msra.mxu0 %v28_v0 }
   0x4   :  { %10 = vsyncpa [#allocation3], 0  ;;  %259 = vmatprep.subr.mxu0 %v27_v1  ;;  %269 = vmatprep.mubr.msk.f32.mxu0 %vm36_vm0, %v21_v3  ;;  %v25_v4 = vld [vmem:[%s396_s1 + $0x10] sm:$0xff]  ;;  %v24_v5 = vld [vmem:[%s396_s1 + $0x8] sm:$0xff]  ;;  %v302_v12 = vmov 0.0   ;;  %vm140_vm1 = vcmask 261120   ;;  %v130_v24 = vlaneseq }
   0x5   :  { %260 = vmatpush3.msra.mxu0 %v27_v1  ;;  %v23_v6 = vld [vmem:[%s396_s1] sm:$0xff]  ;;  %v22_v7 = vld [vmem:[%s395_s0 + $0x8] sm:$0xff]  ;;  %v127_v8 = vld [vmem:[%s398_s3 + $0x38] sm:$0xff]  ;;  %211 = vmatprep.mubr.f32.mxu1 %v302_v12 }
   0x6   :  { %261 = vmatprep.subr.mxu0 %v26_v2  ;;  %v126_v9 = vld [vmem:[%s398_s3 + $0x30] sm:$0xff]  ;;  %v125_v10 = vld [vmem:[%s398_s3 + $0x28] sm:$0xff]  ;;  %171 = vmatprep.subr.mxu1 %v127_v8  ;;  %v124_v11 = vld [vmem:[%s398_s3 + $0x20] sm:$0xff]  ;;  %v131_v25 = vshrl.u32 %v130_v24, 7 }
   0x7   :  { %262 = vmatpush3.msra.mxu0 %v26_v2  ;;  %172 = vmatpush1.msra.mxu1 %v126_v9  ;;  %v123_v13 = vld [vmem:[%s398_s3 + $0x18] sm:$0xff]  ;;  %v122_v14 = vld [vmem:[%s398_s3 + $0x10] sm:$0xff]  ;;  %v121_v15 = vld [vmem:[%s398_s3 + $0x8] sm:$0xff] }
   0x8   :  { %263 = vmatprep.subr.mxu0 %v25_v4  ;;  %173 = vmatprep.subr.mxu1 %v125_v10  ;;  %v120_v16 = vld [vmem:[%s398_s3] sm:$0xff]  ;;  %v132_v26 = vsub.s32 0, %v131_v25  ;;  %v136_v28 = vsub.s32 1, %v131_v25 }
   0x9   :  { %264 = vmatpush3.msra.mxu0 %v25_v4  ;;  %174 = vmatpush1.msra.mxu1 %v124_v11  ;;  %v244_v18 = vld [vmem:[%s397_s2] ss:$0 sm:$0xff]  ;;  %s303_s2 = smov [#allocation2]  }
   0xa   :  { %265 = vmatprep.subr.mxu0 %v24_v5  ;;  %175 = vmatprep.subr.mxu1 %v123_v13  ;;  %v128_v27 = vld [vmem:[%s399_s4] sm:$0x3]  ;;  %s233_s26 = sshll.u32 %s303_s2, 4  ;;  %s234_s26 = int_to_ptr.vmem [resolvable:$true] %s233_s26 }
   0xb   :  { %266 = vmatpush3.msra.mxu0 %v24_v5  ;;  %176 = vmatpush1.msra.mxu1 %v122_v14  ;;  %v133_v29 = vrot.slane %v128_v27, %v132_v26  ;;  %v137_v30 = vrot.slane %v128_v27, %v136_v28  ;;  %s280_s27 = scalar_lea.vmem %s234_s26, 512  ;;  %p285_p1 = scmp.lt.s32.totalorder %s234_s26, %s234_s26 }
   0xc   :  { %267 = vmatprep.subr.mxu0 %v23_v6  ;;  %177 = vmatprep.subr.mxu1 %v121_v15  ;;  %p281_p0 = scmp.ne.s32.totalorder %s234_s26, %s280_s27  ;;  %p286_p2 = scmp.lt.s32.totalorder %s280_s27, %s280_s27 }
   0xd   :  { %268 = vmatpush3.msra.mxu0 %v23_v6  ;;  %178 = vmatpush1.msra.mxu1 %v120_v16 }
   0xe   :  { %270 = vmatmul.mubr.msk.f32.vlgmr.msra.gmra.mxu0 %vm36_vm0, %v22_v7  ;;  %p287_p3 = por %p286_p2, %p285_p1 }
  0x10   :  { %p288_p4 = pnand %p287_p3, %p281_p0 }
  0xce   :  { %v271_v17 = vpop.f32.mrf.mxu0 }
  0xcf   :  { %v115_v21 = vadd.f32 %v271_v17, %v244_v18 }
  0xd0   :  { %v109_v19 = vpop.f32.mrf.mxu0 }
  0xd1   :  { %v110_v20 = vadd.f32 %v244_v18, %v109_v19 }
  0xd3   :  { %276 = vtanh.f32 %v110_v20 }
  0xd4   :  { %278 = vtanh.f32 %v115_v21 }
  0xe0   :  { %v277_v22 = vpop.eup %276 }
  0xe1   :  { %247 = vmatmul.mubr.msk.f32.vlgmr.msra.gmra.mxu1 %vm140_vm1, %v277_v22  ;;  %v279_v23 = vpop.eup %278 }
  0xe2   :  { %217 = vmatprep.mubr.f32.mxu1 %v302_v12 }
  0xe5   :  { %248 = vmatmul.mubr.msk.f32.gmra.mxu1 %vm140_vm1, %v279_v23 }
 0x1a1   :  { %v213_v31 = vpop.f32.mrf.mxu1 }
 0x1a2   :  { %v214_v32 = vadd.f32 %v213_v31, %v133_v29 }
 0x1a3   :  { %v215_v33 = vpop.f32.mrf.mxu1 }
 0x1a4   :  { %224 = vst [vmem:[#allocation2] sm:$0xff] %v214_v32  ;;  %v216_v34 = vadd.f32 %v215_v33, %v137_v30 }
 0x1a5   :  { %v219_v35 = vpop.f32.mrf.mxu1 }
 0x1a6   :  { %225 = vst [vmem:[#allocation2 + $0x8] sm:$0xff] %v216_v34  ;;  %v220_v36 = vadd.f32 %v219_v35, %v133_v29 }
 0x1a7   :  { %v221_v37 = vpop.f32.mrf.mxu1 }
 0x1a8   :  { %226 = vst [vmem:[#allocation2 + $0x10] sm:$0xff] %v220_v36  ;;  %v222_v38 = vadd.f32 %v221_v37, %v137_v30 }
 0x1aa   :  { %227 = vst [vmem:[#allocation2 + $0x18] sm:$0xff] %v222_v38 }
 0x1ab   :  { %291 = shalt.err (!%p288_p4)
}
 0x1ac   :  { %s304_s4 = smov 256   ;;  %s305_s28 = smov 16  }
 0x1ad   :  { %239 = dma.vmem_to_hbm [thread:$0]  %s234_s26, 512, %s400_s5, [#allocation3], %s304_s4, %s304_s4, %s305_s28  }
 0x1ae   :  { %300 = dma.done.wait [#allocation3], 512  }
 0x1af   :  { %301 = vsyncadd [#allocation3], 4294966784 }
 0x1b0   :  { %243 = vsyncpa [#allocation3], 1 }

</bundles_post_ra>
